<compile_context>
chip_gen: v7x
topology: tpu7x:2x2x1
jax: 0.10.0
libtpu: 0.0.40
codegen_flags: <defaults>
</compile_context>

<pallas_src>
import functools
import math

import jax
import jax.numpy as jnp
import numpy as np
from jax.experimental import pallas as pl
from jax.experimental.pallas import tpu as pltpu

_LANE = 128      # TPU lane width (minor dim)
_SUBLANE = 8     # f32 sublane tile (second-minor dim)


def _fused_gcn_kernel(x_ref, adj_ref, mask_ref, dinv_ref, w_ref, b_ref, o_ref,
                      *, num_layers):
    """All GCN layers (+mask+ReLU) for one block of `Bb` graphs, fused."""
    Bb, N, Fp = x_ref.shape

    # int8 (0/1) adjacency -> bf16 MXU operand; exact, half the HBM bytes.
    adj = adj_ref[...].astype(jnp.bfloat16)       # (Bb, N, N)
    mask = mask_ref[...]                          # (Bb, N, 1) f32
    dinv = dinv_ref[...]                          # (Bb, N, 1) f32
    # Activation stays on-chip across all layers, carried in bf16 (MXU inputs
    # are bf16 anyway; halves vreg/VMEM pressure for large N).
    h = x_ref[...].astype(jnp.bfloat16)           # (Bb, N, Fp)

    # Static unroll: num_layers is small (2-4 in practice).
    # TODO(synk): switch to lax.fori_loop with dynamic w_ref[l] if layers > ~4.
    for l in range(num_layers):
        w = w_ref[l]                              # (Fp, Fp) bf16 (zero padded)
        b = b_ref[l]                              # (1, Fp)  f32 (zero padded)

        # Linear transform flattened over the graph block: the MXU sees Bb*N
        # rows instead of N (important for tiny graphs).  f32 accumulation.
        xw = jnp.dot(h.reshape(Bb * N, Fp), w,
                     preferred_element_type=jnp.float32).reshape(Bb, N, Fp)

        # Normalized aggregation without materializing adj_n:
        #   adj_n @ xw == dinv * (adj @ (dinv * xw))
        agg = jnp.einsum("bnm,bmf->bnf", adj,
                         (dinv * xw).astype(jnp.bfloat16),
                         preferred_element_type=jnp.float32)

        out = (dinv * agg + b) * mask             # bias + node mask (padding->0)
        h = jnp.maximum(out, 0.0).astype(jnp.bfloat16)  # ReLU; dropout = id (eval)

    o_ref[...] = h                                # bf16, lane-dense store


def _step_vmem_bytes(bb, n, fp, num_layers):
    """Rough per-grid-step VMEM footprint (double-buffered I/O + f32 temps)."""
    x_in = bb * n * fp * 4                        # f32 input block
    adj = bb * n * n * 1                          # int8 adjacency block
    vecs = 2 * bb * n * _LANE * 4                 # mask + dinv (lane padded)
    out = bb * n * fp * 2                         # bf16 output block
    wgt = num_layers * fp * fp * 2 + num_layers * _SUBLANE * fp * 4
    temps = 8 * bb * n * fp * 4                   # xw/agg/out f32 temps, headroom
    return 2 * (x_in + adj + vecs + out) + 2 * wgt + temps


def fused_gcn_forward(x_p, adj_i8, mask3, dinv, w_stack, b_stack, *, block_b,
                      vmem_limit_bytes):
    """x_p:(Bp,N,Fp) f32, adj_i8:(Bp,N,N) int8, mask3/dinv:(Bp,N,1) f32,
    w_stack:(L,Fp,Fp) bf16, b_stack:(L,1,Fp) f32  ->  (Bp,N,Fp) bf16."""
    Bp, N, Fp = x_p.shape
    L = w_stack.shape[0]
    assert Bp % block_b == 0
    kernel = functools.partial(_fused_gcn_kernel, num_layers=L)

    return pl.pallas_call(
        kernel,
        out_shape=jax.ShapeDtypeStruct((Bp, N, Fp), jnp.bfloat16),
        grid_spec=pltpu.PrefetchScalarGridSpec(
            num_scalar_prefetch=0,
            grid=(Bp // block_b,),
            in_specs=[
                pl.BlockSpec((block_b, N, Fp), lambda i: (i, 0, 0)),  # x
                pl.BlockSpec((block_b, N, N), lambda i: (i, 0, 0)),   # adj int8
                pl.BlockSpec((block_b, N, 1), lambda i: (i, 0, 0)),   # mask
                pl.BlockSpec((block_b, N, 1), lambda i: (i, 0, 0)),   # dinv
                # Layer-invariant weights: constant block index, so they are
                # only DMA'd once across the whole grid.
                # TODO(synk): pipeline_mode=pl.Buffered(1) would also drop the
                # redundant second VMEM buffer (~100 KB) once broadly supported.
                pl.BlockSpec((L, Fp, Fp), lambda i: (0, 0, 0)),       # W stack
                pl.BlockSpec((L, 1, Fp), lambda i: (0, 0, 0)),        # b stack
            ],
            out_specs=pl.BlockSpec((block_b, N, Fp), lambda i: (i, 0, 0)),
        ),
        compiler_params=pltpu.CompilerParams(
            # Batch blocks are independent.
            # TODO(synk): switch to pltpu.CORE_PARALLEL / pl.core_map if xprof
            # shows one v7x TensorCore idle.
            dimension_semantics=("parallel",),
            vmem_limit_bytes=vmem_limit_bytes,
        ),
    )(x_p, adj_i8, mask3, dinv, w_stack, b_stack)


class GeomGGNNBlockPallas:
    """JAX/Pallas port of GeomGGNNBlock with conv='gcn' (eval mode)."""

    _TARGET_ROWS = 256                 # aim for >= this many MXU rows per matmul
    _VMEM_BUDGET = 40 * 1024 * 1024    # per-step budget (fits v7x 64 MiB w/ headroom)

    def __init__(self, graph_init_dim, filters, dropout=0.0, key=None):
        self.filters = list(filters)
        self.num_layers = len(self.filters)
        self.dropout = dropout  # identity in eval mode
        self.graph_init_dim = graph_init_dim

        # Lane-dense padded feature width (multiple of 128) so stores are
        # unmasked vst and all layer weights stack into one tensor.
        max_dim = max([graph_init_dim] + self.filters)
        self.feat_pad = int(math.ceil(max_dim / _LANE)) * _LANE

        key = key if key is not None else jax.random.PRNGKey(0)
        self.params = []
        in_dim = graph_init_dim
        for out_dim in self.filters:
            key, kw, kb = jax.random.split(key, 3)
            limit = float(np.sqrt(6.0 / (in_dim + out_dim)))
            w = jax.random.uniform(kw, (in_dim, out_dim), jnp.float32,
                                   minval=-limit, maxval=limit)
            b = 0.1 * jax.random.normal(kb, (out_dim,), jnp.float32)
            self.params.append((w, b))
            in_dim = out_dim

        # Stacked, zero-padded weights for the fused kernel.
        Fp, L = self.feat_pad, self.num_layers
        w_stack = np.zeros((L, Fp, Fp), np.float32)
        b_stack = np.zeros((L, 1, Fp), np.float32)
        for l, (w, b) in enumerate(self.params):
            fi, fo = w.shape
            w_stack[l, :fi, :fo] = np.asarray(w)
            b_stack[l, 0, :fo] = np.asarray(b)
        self.w_stack = jnp.asarray(w_stack, jnp.bfloat16)  # MXU inputs in bf16
        self.b_stack = jnp.asarray(b_stack, jnp.float32)

    def __call__(self, x, adj, mask=None, collect_intermediate=False):
        if collect_intermediate:
            # TODO(synk): per-layer intermediates not wired through fused kernel.
            raise NotImplementedError("collect_intermediate not supported")

        B, N, Fin = x.shape
        Fp = self.feat_pad

        if mask is None:
            mask3 = jnp.ones((B, N, 1), jnp.float32)
        else:
            mask3 = mask.reshape(B, N, 1).astype(jnp.float32)

        # ---- node padding to a multiple of 8 sublanes (keeps the in-kernel
        # flatten/unflatten reshapes layout-trivial).  Padded nodes have zero
        # adjacency rows/cols and zero mask, so they do not affect real nodes.
        Np = int(math.ceil(N / _SUBLANE)) * _SUBLANE
        pad_n = Np - N
        adj_f = adj.astype(jnp.float32)
        if pad_n:
            adj_f = jnp.pad(adj_f, ((0, 0), (0, pad_n), (0, pad_n)))
            mask3 = jnp.pad(mask3, ((0, 0), (0, pad_n), (0, 0)))
            x = jnp.pad(x, ((0, 0), (0, pad_n), (0, 0)))

        # ---- pick how many graphs share one grid step so the flattened
        # W-matmul sees >= _TARGET_ROWS rows, then shrink to fit VMEM.
        block_b = max(1, min(B, self._TARGET_ROWS // Np))
        while block_b > 1 and _step_vmem_bytes(
                block_b, Np, Fp, self.num_layers) > self._VMEM_BUDGET:
            block_b -= 1
        step_bytes = _step_vmem_bytes(block_b, Np, Fp, self.num_layers)
        if step_bytes > self._VMEM_BUDGET:
            # TODO(synk): node-dimension tiling for very large graphs.
            raise NotImplementedError(
                f"graph too large for un-tiled kernel (~{step_bytes} B / step)")
        vmem_limit = int(min(96 * 1024 * 1024,
                             max(8 * 1024 * 1024, 2 * step_bytes)))

        # ---- batch padding to a multiple of block_b (zero graphs, masked out).
        Bp = int(math.ceil(B / block_b)) * block_b
        pad_b = Bp - B
        if pad_b:
            adj_f = jnp.pad(adj_f, ((0, pad_b), (0, 0), (0, 0)))
            mask3 = jnp.pad(mask3, ((0, pad_b), (0, 0), (0, 0)))
            x = jnp.pad(x, ((0, pad_b), (0, 0), (0, 0)))

        # Hoisted degree normalization (adj is constant across layers).  As in
        # DenseGCNConv, degrees come from the (unmasked) adjacency itself.
        deg = jnp.sum(adj_f, axis=-1, keepdims=True)
        dinv = jax.lax.rsqrt(jnp.maximum(deg, 1.0))

        x_p = jnp.pad(x.astype(jnp.float32), ((0, 0), (0, 0), (0, Fp - Fin)))
        # 0/1 adjacency is exact in int8 and halves the dominant adj DMA.
        # TODO(synk): keep an f32 adjacency path if callers pass weighted adj.
        adj_i8 = adj_f.astype(jnp.int8)

        out_p = fused_gcn_forward(x_p, adj_i8, mask3, dinv,
                                  self.w_stack, self.b_stack,
                                  block_b=block_b, vmem_limit_bytes=vmem_limit)
        return out_p[:B, :N, : self.filters[-1]].astype(jnp.float32)


def _reference_forward(x, adj, mask, params):
    """Pure-jnp f32 reference of the same forward pass (for verification)."""
    B, N, _ = x.shape
    mask3 = mask.reshape(B, N, 1).astype(jnp.float32)
    h = x.astype(jnp.float32)
    for (w, b) in params:
        hw = jnp.einsum("bnf,fo->bno", h, w)
        deg = jnp.maximum(adj.sum(-1), 1.0)
        dinv = deg ** -0.5
        adj_n = dinv[:, :, None] * adj * dinv[:, None, :]
        out = jnp.einsum("bnm,bmo->bno", adj_n, hw) + b
        out = out * mask3
        h = jnp.maximum(out, 0.0)
    return h


if __name__ == "__main__":
    # Small shapes consistent with the module: batch=2, nodes=16,
    # graph_init_dim=16, filters="32_16".
    B, N = 2, 16
    graph_init_dim = 16
    filters = [32, 16]

    key = jax.random.PRNGKey(0)
    kx, ka, kp = jax.random.split(key, 3)

    x = jax.random.normal(kx, (B, N, graph_init_dim), jnp.float32)
    # random symmetric 0/1 adjacency, no self-loops (add_loop=False path)
    a = (jax.random.uniform(ka, (B, N, N)) > 0.5).astype(jnp.float32)
    adj = jnp.clip(a + jnp.swapaxes(a, -1, -2), 0.0, 1.0)
    adj = adj * (1.0 - jnp.eye(N, dtype=jnp.float32)[None])
    # node mask: last 3 nodes of each graph are padding
    mask = jnp.concatenate(
        [jnp.ones((B, N - 3), jnp.float32), jnp.zeros((B, 3), jnp.float32)], axis=1
    )

    block = GeomGGNNBlockPallas(graph_init_dim, filters, dropout=0.1, key=kp)

    out = block(x, adj, mask=mask)
    out = jax.block_until_ready(out)

    ref = _reference_forward(x, adj, mask, block.params)
    # Tolerance accounts for bf16 MXU inputs / bf16-carried activations with
    # f32 accumulation.
    np.testing.assert_allclose(np.asarray(out), np.asarray(ref), rtol=5e-2, atol=5e-2)

    assert out.shape == (B, N, filters[-1])
    print("KERNEL_OK")
</pallas_src>

<mosaic_0001>
module attributes {stable_mosaic.version = 11 : i64} {
  func.func @_fused_gcn_kernel(%arg0: i32, %arg1: memref<2x16x128xf32, #tpu.memory_space<vmem>>, %arg2: memref<2x16x16xi8, #tpu.memory_space<vmem>>, %arg3: memref<2x16x1xf32, #tpu.memory_space<vmem>>, %arg4: memref<2x16x1xf32, #tpu.memory_space<vmem>>, %arg5: memref<2x128x128xbf16, #tpu.memory_space<vmem>>, %arg6: memref<2x1x128xf32, #tpu.memory_space<vmem>>, %arg7: memref<2x16x128xbf16, #tpu.memory_space<vmem>>) attributes {dimension_semantics = [#tpu.dimension_semantics<parallel>], iteration_bounds = array<i64: 1>, scalar_prefetch = 0 : i64, scratch_operands = 0 : i64, tpu.core_type = #tpu.core_type<tc>, window_params = [{transform_indices = @transform_0, window_bounds = array<i64: 2, 16, 128>}, {transform_indices = @transform_1, window_bounds = array<i64: 2, 16, 16>}, {transform_indices = @transform_2, window_bounds = array<i64: 2, 16, 1>}, {transform_indices = @transform_3, window_bounds = array<i64: 2, 16, 1>}, {pipeline_mode = #tpu.pipeline_mode<synchronous>, transform_indices = @transform_4, window_bounds = array<i64: 2, 128, 128>}, {pipeline_mode = #tpu.pipeline_mode<synchronous>, transform_indices = @transform_5, window_bounds = array<i64: 2, 1, 128>}, {transform_indices = @transform_6, window_bounds = array<i64: 2, 16, 128>}]} {
    %c0 = arith.constant 0 : index
    %c0_0 = arith.constant 0 : index
    %c0_1 = arith.constant 0 : index
    %0 = vector.load %arg2[%c0, %c0_0, %c0_1] : memref<2x16x16xi8, #tpu.memory_space<vmem>>, vector<2x16x16xi8>
    %1 = arith.sitofp %0 : vector<2x16x16xi8> to vector<2x16x16xbf16>
    %c0_2 = arith.constant 0 : index
    %c0_3 = arith.constant 0 : index
    %c0_4 = arith.constant 0 : index
    %2 = vector.load %arg3[%c0_2, %c0_3, %c0_4] : memref<2x16x1xf32, #tpu.memory_space<vmem>>, vector<2x16x1xf32>
    %c0_5 = arith.constant 0 : index
    %c0_6 = arith.constant 0 : index
    %c0_7 = arith.constant 0 : index
    %3 = vector.load %arg4[%c0_5, %c0_6, %c0_7] : memref<2x16x1xf32, #tpu.memory_space<vmem>>, vector<2x16x1xf32>
    %c0_8 = arith.constant 0 : index
    %c0_9 = arith.constant 0 : index
    %c0_10 = arith.constant 0 : index
    %4 = vector.load %arg1[%c0_8, %c0_9, %c0_10] : memref<2x16x128xf32, #tpu.memory_space<vmem>>, vector<2x16x128xf32>
    %5 = arith.truncf %4 : vector<2x16x128xf32> to vector<2x16x128xbf16>
    %c0_11 = arith.constant 0 : index
    %c0_12 = arith.constant 0 : index
    %c0_13 = arith.constant 0 : index
    %6 = vector.load %arg5[%c0_11, %c0_12, %c0_13] : memref<2x128x128xbf16, #tpu.memory_space<vmem>>, vector<1x128x128xbf16>
    %7 = vector.shape_cast %6 : vector<1x128x128xbf16> to vector<128x128xbf16>
    %c0_14 = arith.constant 0 : index
    %c0_15 = arith.constant 0 : index
    %c0_16 = arith.constant 0 : index
    %8 = vector.load %arg6[%c0_14, %c0_15, %c0_16] : memref<2x1x128xf32, #tpu.memory_space<vmem>>, vector<1x1x128xf32>
    %9 = vector.shape_cast %8 : vector<1x1x128xf32> to vector<1x128xf32>
    %10 = vector.shape_cast %5 : vector<2x16x128xbf16> to vector<32x128xbf16>
    %cst = arith.constant dense<0.000000e+00> : vector<32x128xf32>
    %11 = tpu.matmul %10, %7, %cst {dimension_numbers = #tpu.dot_dimension_numbers<[1], [0], [0], [1], [0, 0, 1, 1], [], []>} : vector<32x128xbf16>, vector<128x128xbf16>, vector<32x128xf32> -> vector<32x128xf32>
    %12 = vector.shape_cast %11 : vector<32x128xf32> to vector<2x16x128xf32>
    %13 = vector.broadcast %3 : vector<2x16x1xf32> to vector<2x16x128xf32>
    %14 = arith.mulf %13, %12 : vector<2x16x128xf32>
    %15 = arith.truncf %14 : vector<2x16x128xf32> to vector<2x16x128xbf16>
    "tpu.trace_start"() <{level = 10 : i32, message = "bnm,bmf->bnf"}> : () -> ()
    %cst_17 = arith.constant dense<0.000000e+00> : vector<2x16x128xf32>
    %16 = tpu.matmul %1, %15, %cst_17 {dimension_numbers = #tpu.dot_dimension_numbers<[2], [1], [1], [2], [0, 0, 0, 1, 1, 2], [0], [0]>} : vector<2x16x16xbf16>, vector<2x16x128xbf16>, vector<2x16x128xf32> -> vector<2x16x128xf32>
    "tpu.trace_stop"() : () -> ()
    %17 = vector.broadcast %3 : vector<2x16x1xf32> to vector<2x16x128xf32>
    %18 = arith.mulf %17, %16 : vector<2x16x128xf32>
    %19 = vector.shape_cast %9 : vector<1x128xf32> to vector<1x1x128xf32>
    %20 = vector.broadcast %19 : vector<1x1x128xf32> to vector<2x16x128xf32>
    %21 = arith.addf %18, %20 : vector<2x16x128xf32>
    %22 = vector.broadcast %2 : vector<2x16x1xf32> to vector<2x16x128xf32>
    %23 = arith.mulf %21, %22 : vector<2x16x128xf32>
    %cst_18 = arith.constant 0.000000e+00 : f32
    %24 = vector.broadcast %cst_18 : f32 to vector<2x16x128xf32>
    %25 = arith.maximumf %23, %24 : vector<2x16x128xf32>
    %26 = arith.truncf %25 : vector<2x16x128xf32> to vector<2x16x128xbf16>
    %c1 = arith.constant 1 : index
    %c0_19 = arith.constant 0 : index
    %c0_20 = arith.constant 0 : index
    %27 = vector.load %arg5[%c1, %c0_19, %c0_20] : memref<2x128x128xbf16, #tpu.memory_space<vmem>>, vector<1x128x128xbf16>
    %28 = vector.shape_cast %27 : vector<1x128x128xbf16> to vector<128x128xbf16>
    %c1_21 = arith.constant 1 : index
    %c0_22 = arith.constant 0 : index
    %c0_23 = arith.constant 0 : index
    %29 = vector.load %arg6[%c1_21, %c0_22, %c0_23] : memref<2x1x128xf32, #tpu.memory_space<vmem>>, vector<1x1x128xf32>
    %30 = vector.shape_cast %29 : vector<1x1x128xf32> to vector<1x128xf32>
    %31 = vector.shape_cast %26 : vector<2x16x128xbf16> to vector<32x128xbf16>
    %cst_24 = arith.constant dense<0.000000e+00> : vector<32x128xf32>
    %32 = tpu.matmul %31, %28, %cst_24 {dimension_numbers = #tpu.dot_dimension_numbers<[1], [0], [0], [1], [0, 0, 1, 1], [], []>} : vector<32x128xbf16>, vector<128x128xbf16>, vector<32x128xf32> -> vector<32x128xf32>
    %33 = vector.shape_cast %32 : vector<32x128xf32> to vector<2x16x128xf32>
    %34 = vector.broadcast %3 : vector<2x16x1xf32> to vector<2x16x128xf32>
    %35 = arith.mulf %34, %33 : vector<2x16x128xf32>
    %36 = arith.truncf %35 : vector<2x16x128xf32> to vector<2x16x128xbf16>
    "tpu.trace_start"() <{level = 10 : i32, message = "bnm,bmf->bnf"}> : () -> ()
    %cst_25 = arith.constant dense<0.000000e+00> : vector<2x16x128xf32>
    %37 = tpu.matmul %1, %36, %cst_25 {dimension_numbers = #tpu.dot_dimension_numbers<[2], [1], [1], [2], [0, 0, 0, 1, 1, 2], [0], [0]>} : vector<2x16x16xbf16>, vector<2x16x128xbf16>, vector<2x16x128xf32> -> vector<2x16x128xf32>
    "tpu.trace_stop"() : () -> ()
    %38 = vector.broadcast %3 : vector<2x16x1xf32> to vector<2x16x128xf32>
    %39 = arith.mulf %38, %37 : vector<2x16x128xf32>
    %40 = vector.shape_cast %30 : vector<1x128xf32> to vector<1x1x128xf32>
    %41 = vector.broadcast %40 : vector<1x1x128xf32> to vector<2x16x128xf32>
    %42 = arith.addf %39, %41 : vector<2x16x128xf32>
    %43 = vector.broadcast %2 : vector<2x16x1xf32> to vector<2x16x128xf32>
    %44 = arith.mulf %42, %43 : vector<2x16x128xf32>
    %cst_26 = arith.constant 0.000000e+00 : f32
    %45 = vector.broadcast %cst_26 : f32 to vector<2x16x128xf32>
    %46 = arith.maximumf %44, %45 : vector<2x16x128xf32>
    %47 = arith.truncf %46 : vector<2x16x128xf32> to vector<2x16x128xbf16>
    %c0_27 = arith.constant 0 : index
    %c0_28 = arith.constant 0 : index
    %c0_29 = arith.constant 0 : index
    %48 = vector.load %arg7[%c0_27, %c0_28, %c0_29] : memref<2x16x128xbf16, #tpu.memory_space<vmem>>, vector<2x16x128xbf16>
    tpu.vector_store %arg7[%c0_27, %c0_28, %c0_29], %47 {strides = array<i32>} : memref<2x16x128xbf16, #tpu.memory_space<vmem>>, vector<2x16x128xbf16>,
    return
  }
  func.func @transform_0(%arg0: i32) -> (i32, i32, i32) {
    %c0_i32 = arith.constant 0 : i32
    %c0_i32_0 = arith.constant 0 : i32
    %c0_i32_1 = arith.constant 0 : i32
    return %arg0, %c0_i32, %c0_i32_0 : i32, i32, i32
  }
  func.func @transform_1(%arg0: i32) -> (i32, i32, i32) {
    %c0_i32 = arith.constant 0 : i32
    %c0_i32_0 = arith.constant 0 : i32
    %c0_i32_1 = arith.constant 0 : i32
    return %arg0, %c0_i32, %c0_i32_0 : i32, i32, i32
  }
  func.func @transform_2(%arg0: i32) -> (i32, i32, i32) {
    %c0_i32 = arith.constant 0 : i32
    %c0_i32_0 = arith.constant 0 : i32
    %c0_i32_1 = arith.constant 0 : i32
    return %arg0, %c0_i32, %c0_i32_0 : i32, i32, i32
  }
  func.func @transform_3(%arg0: i32) -> (i32, i32, i32) {
    %c0_i32 = arith.constant 0 : i32
    %c0_i32_0 = arith.constant 0 : i32
    %c0_i32_1 = arith.constant 0 : i32
    return %arg0, %c0_i32, %c0_i32_0 : i32, i32, i32
  }
  func.func @transform_4(%arg0: i32) -> (i32, i32, i32) {
    %c0_i32 = arith.constant 0 : i32
    %c0_i32_0 = arith.constant 0 : i32
    %c0_i32_1 = arith.constant 0 : i32
    %c0_i32_2 = arith.constant 0 : i32
    return %c0_i32, %c0_i32_0, %c0_i32_1 : i32, i32, i32
  }
  func.func @transform_5(%arg0: i32) -> (i32, i32, i32) {
    %c0_i32 = arith.constant 0 : i32
    %c0_i32_0 = arith.constant 0 : i32
    %c0_i32_1 = arith.constant 0 : i32
    %c0_i32_2 = arith.constant 0 : i32
    return %c0_i32, %c0_i32_0, %c0_i32_1 : i32, i32, i32
  }
  func.func @transform_6(%arg0: i32) -> (i32, i32, i32) {
    %c0_i32 = arith.constant 0 : i32
    %c0_i32_0 = arith.constant 0 : i32
    %c0_i32_1 = arith.constant 0 : i32
    return %arg0, %c0_i32, %c0_i32_0 : i32, i32, i32
  }
}

</mosaic_0001>

<bundles_post_ra>
// kernel: tpu_custom_call.1
= control target key start
LH: loop header
LB: loop body
LE: loop exit
PB: predicated region body
PF: predicated region fallthrough
CT: control target
= control target key end

     0   :  { %11 = vsyncpa [#allocation3], 0  ;;  %s990_s0 = inlined_call_operand.vmem [shape: f32[2,16,128], index: 0, kind: input, shape index: {}]   ;;  %s991_s1 = inlined_call_operand.vmem [shape: s8[2,16,16], index: 1, kind: input, shape index: {}]   ;;  %s992_s2 = inlined_call_operand.vmem [shape: f32[2,16,1], index: 2, kind: input, shape index: {}]   ;;  %s993_s3 = inlined_call_operand.vmem [shape: f32[2,16,1], index: 3, kind: input, shape index: {}]   ;;  %s994_s4 = inlined_call_operand.hbm [shape: bf16[2,128,128], index: 4, kind: input, shape index: {}]   ;;  %s995_s5 = inlined_call_operand.vmem [shape: f32[2,1,128], index: 5, kind: input, shape index: {}]   ;;  %s996_s6 = inlined_call_operand.hbm [shape: bf16[2,16,128], index: 6, kind: output, shape index: {}]  }
   0x1   :  { %12 = vsyncpa [#allocation4], 0  ;;  %s816_s21 = smov [#allocation2]   ;;  %s768_s25 = scalar_lea.hbm %s994_s4, 2048 }
   0x2   :  { %s26_s22 = sshll.u32 %s816_s21, 4  ;;  %p769_p0 = scmp.ne.s32.totalorder %s994_s4, %s768_s25  ;;  %s27_s22 = int_to_ptr.vmem [resolvable:$true] %s26_s22 }
   0x3   :  { %p772_p1 = scmp.lt.u32.totalorder %s768_s25, %s994_s4 }
   0x5   :  { %p774_p2 = pnand %p772_p1, %p769_p0 }
   0x7   :  { %777 = shalt.err (!%p774_p2)
}
   0x8   :  { %s778_s30 = scalar_lea.vmem %s27_s22, 2048  ;;  %p783_p4 = scmp.lt.s32.totalorder %s27_s22, %s27_s22 }
   0x9   :  { %p779_p3 = scmp.ne.s32.totalorder %s27_s22, %s778_s30  ;;  %p784_p5 = scmp.lt.s32.totalorder %s778_s30, %s778_s30 }
   0xb   :  { %p785_p6 = por %p784_p5, %p783_p4 }
   0xd   :  { %p786_p7 = pnand %p785_p6, %p779_p3 }
   0xf   :  { %789 = shalt.err (!%p786_p7)
}
  0x10   :  { %s817_s7 = smov 64   ;;  %s818_s8 = smov 4  }
  0x11   :  { %32 = dma.hbm_to_vmem [thread:$0]  %s994_s4, 2048, %s27_s22, [#allocation3], %s817_s7, %s817_s7, %s818_s8  }
  0x12   :  { %812 = dma.done.wait [#allocation3], 2048  }
  0x13   :  { %813 = vsyncadd [#allocation3], 4294965248  ;;  %v819_v0 = vmov 0   ;;  %v752_v1 = vld [vmem:[#allocation2] sm:$0xff]   ;;  %v753_v2 = vld [vmem:[#allocation2 + $0x8] sm:$0xff]   ;;  %v820_v23 = vmov 0.0  }
  0x14   :  { %750 = vset.pattern.permute.xlu0 %v819_v0  ;;  %751 = vset.pattern.permute.xlu1 %v819_v0  ;;  %v754_v3 = vld [vmem:[#allocation2 + $0x10] sm:$0xff]   ;;  %v755_v4 = vld [vmem:[#allocation2 + $0x18] sm:$0xff]   ;;  %v55_v5 = vld [vmem:[%s990_s0] sm:$0xff]  ;;  %vm821_vm0 = vmmov 0   ;;  %vm206_vm1 = vcmask 130048  }
  0x15   :  { %679 = vmatprep.subr.bf16.mxu0 %v752_v1  ;;  %v56_v6 = vld [vmem:[%s990_s0 + $0x8] sm:$0xff]  ;;  %v51_v8 = vld [vmem:[%s993_s3] sm:$0xff]  ;;  %v53_v9 = vld [vmem:[%s993_s3 + $0x10] sm:$0xff]  ;;  %699 = vmatprep.subr.bf16.mxu1 %v820_v23 }
  0x16   :  { %680 = vmatpush3.bf16.msra.mxu0 %v752_v1  ;;  %v59_v7 = vpack.c.bf16 %v56_v6, %v55_v5  ;;  %177 = vperm.xlu0 %750, %v51_v8   ;;  %v756_v10 = vld [vmem:[#allocation2 + $0x20] sm:$0xff]   ;;  %v52_v11 = vld [vmem:[%s993_s3 + $0x8] sm:$0xff]  ;;  %v54_v12 = vld [vmem:[%s993_s3 + $0x18] sm:$0xff] }
  0x17   :  { %681 = vmatprep.subr.bf16.mxu0 %v753_v2  ;;  %187 = vperm.xlu1 %751, %v53_v9   ;;  %v47_v13 = vld [vmem:[%s992_s2] sm:$0xff]  ;;  %v757_v14 = vld [vmem:[#allocation2 + $0x28] sm:$0xff]   ;;  %v49_v16 = vld [vmem:[%s992_s2 + $0x10] sm:$0xff] }
  0x18   :  { %695 = vmatprep.mubr.bf16.mxu0 %v59_v7  ;;  %v48_v15 = vld [vmem:[%s992_s2 + $0x8] sm:$0xff]  ;;  %v758_v17 = vld [vmem:[#allocation2 + $0x30] sm:$0xff]   ;;  %v50_v18 = vld [vmem:[%s992_s2 + $0x18] sm:$0xff]  ;;  %701 = vmatprep.mubr.msk.bf16.mxu1 %vm821_vm0, %v820_v23 }
  0x19   :  { %v759_v19 = vld [vmem:[#allocation2 + $0x38] sm:$0xff]   ;;  %v57_v20 = vld [vmem:[%s990_s0 + $0x10] sm:$0xff]  ;;  %v39_v27 = vld [vmem:[%s991_s1] sm:$0x3] }
  0x1a   :  { %682 = vmatpush3.bf16.msra.mxu0 %v753_v2  ;;  %182 = vperm.xlu0 %750, %v52_v11   ;;  %v58_v21 = vld [vmem:[%s990_s0 + $0x18] sm:$0xff]  ;;  %v40_v28 = vld [vmem:[%s991_s1 + $0x2] sm:$0x3]  ;;  %v43_v36 = vunpack.c.l.s8.bf16 %v39_v27  ;;  %v41_v43 = vld [vmem:[%s991_s1 + $0x4] sm:$0x3] }
  0x1b   :  { %683 = vmatprep.subr.bf16.mxu0 %v754_v3  ;;  %192 = vperm.xlu1 %751, %v54_v12   ;;  %v60_v22 = vpack.c.bf16 %v58_v21, %v57_v20  ;;  %v44_v37 = vunpack.c.l.s8.bf16 %v40_v28  ;;  %v42_v44 = vld [vmem:[%s991_s1 + $0x6] sm:$0x3]  ;;  %v45_v46 = vunpack.c.l.s8.bf16 %v41_v43  ;;  %v761_v49 = vld [vmem:[#allocation2 + $0x48] sm:$0xff]   ;;  %v762_v50 = vld [vmem:[#allocation2 + $0x50] sm:$0xff]  }
  0x1c   :  { %v760_v45 = vld [vmem:[#allocation2 + $0x40] sm:$0xff]   ;;  %v46_v47 = vunpack.c.l.s8.bf16 %v42_v44  ;;  %v763_v51 = vld [vmem:[#allocation2 + $0x58] sm:$0xff]   ;;  %v765_v53 = vld [vmem:[#allocation2 + $0x68] sm:$0xff]  }
  0x1d   :  { %v933_v42 = vcombine.low %v43_v36, %v44_v37  ;;  %v764_v52 = vld [vmem:[#allocation2 + $0x60] sm:$0xff]   ;;  %v766_v54 = vld [vmem:[#allocation2 + $0x70] sm:$0xff]   ;;  %v767_v55 = vld [vmem:[#allocation2 + $0x78] sm:$0xff]  }
  0x1e   :  { %684 = vmatpush3.bf16.msra.mxu0 %v754_v3  ;;  %316 = vperm.xlu0 %750, %v47_v13   ;;  %v946_v48 = vcombine.low %v45_v46, %v46_v47  ;;  %v619_v56 = vld [vmem:[%s995_s5] ss:$0 sm:$0xff] }
  0x1f   :  { %685 = vmatprep.subr.bf16.mxu0 %v755_v4  ;;  %321 = vperm.xlu1 %751, %v48_v15  }
  0x22   :  { %686 = vmatpush3.bf16.msra.mxu0 %v755_v4  ;;  %326 = vperm.xlu0 %750, %v49_v16  }
  0x23   :  { %687 = vmatprep.subr.bf16.mxu0 %v756_v10  ;;  %331 = vperm.xlu1 %751, %v50_v18  }
  0x26   :  { %688 = vmatpush3.bf16.msra.mxu0 %v756_v10 }
  0x27   :  { %689 = vmatprep.subr.bf16.mxu0 %v757_v14 }
  0x2a   :  { %690 = vmatpush3.bf16.msra.mxu0 %v757_v14 }
  0x2b   :  { %691 = vmatprep.subr.bf16.mxu0 %v758_v17 }
  0x2e   :  { %692 = vmatpush3.bf16.msra.mxu0 %v758_v17 }
  0x2f   :  { %693 = vmatprep.subr.bf16.mxu0 %v759_v19 }
  0x32   :  { %694 = vmatpush3.bf16.msra.mxu0 %v759_v19 }
  0x33   :  { %731 = vmatprep.subr.bf16.mxu0 %v820_v23 }
  0x35   :  { %696 = vmatmul.mubr.bf16.vlgmr.msra.gmra.mrb[0].mxu0 %v60_v22 }
  0x36   :  { %733 = vmatprep.mubr.msk.bf16.mxu0 %vm821_vm0, %v820_v23 }
  0x95   :  { %v917_v25 = vpop.permute.xlu0 %177 }
  0x96   :  { %v915_v24 = vpop.permute.xlu1 %187 }
  0x99   :  { %v927_v32 = vpop.permute.xlu0 %182 }
  0x9a   :  { %v925_v30 = vpop.permute.xlu1 %192 }
  0x9d   :  { %v317_v0 = vpop.permute.xlu0 %316 }
  0x9e   :  { %v322_v3 = vpop.permute.xlu1 %321 }
  0xa1   :  { %v327_v15 = vpop.permute.xlu0 %326 }
  0xa2   :  { %v332_v18 = vpop.permute.xlu1 %331 }
 0x108   :  { %v697_v26 = vpop.f32.mrb[0].mxu0 }
 0x109   :  { %v160_v29 = vpop.f32.mrb[1].mxu0  ;;  %v197_v33 = vmul.f32 %v697_v26, %v915_v24 }
 0x10a   :  { %v698_v31 = vpop.f32.mrb[2].mxu0  ;;  %v195_v38 = vmul.f32 %v917_v25, %v160_v29 }
 0x10b   :  { %v198_v34 = vmul.f32 %v698_v31, %v925_v30  ;;  %v163_v35 = vpop.f32.mrb[3].mxu0 }
 0x10c   :  { %v196_v39 = vmul.f32 %v927_v32, %v163_v35 }
 0x10d   :  { %v200_v40 = vpack.c.bf16 %v198_v34, %v197_v33 }
 0x10e   :  { %v199_v41 = vpack.c.bf16 %v196_v39, %v195_v38  ;;  %v631_v38 = vld [vmem:[%s995_s5 + $0x1] ss:$0 sm:$0xff]  ;;  %s822_s5 = smov [#allocation5]  }
 0x10f   :  { %s595_s19 = sshll.u32 %s822_s5, 4  ;;  %s596_s19 = int_to_ptr.vmem [resolvable:$true] %s595_s19 }
 0x110   :  { %700 = vmatpush3.bf16.msra.mxu1 %v199_v41  ;;  %s790_s20 = scalar_lea.vmem %s596_s19, 256  ;;  %p795_p9 = scmp.lt.s32.totalorder %s596_s19, %s596_s19 }
 0x111   :  { %705 = vmatprep.subr.bf16.mxu1 %v820_v23  ;;  %p791_p8 = scmp.ne.s32.totalorder %s596_s19, %s790_s20  ;;  %p796_p10 = scmp.lt.s32.totalorder %s790_s20, %s790_s20 }
 0x113   :  { %702 = vmatmul.mubr.msk.bf16.vlgmr.msra.gmra.mrb[0].mxu1 %vm206_vm1, %v933_v42  ;;  %p797_p11 = por %p796_p10, %p795_p9 }
 0x114   :  { %706 = vmatpush3.bf16.msra.mxu1 %v200_v40  ;;  %707 = vmatprep.mubr.msk.bf16.mxu1 %vm821_vm0, %v820_v23 }
 0x115   :  { %711 = vmatprep.subr.bf16.mxu1 %v760_v45  ;;  %p798_p12 = pnand %p797_p11, %p791_p8 }
 0x11b   :  { %708 = vmatmul.mubr.msk.bf16.vlgmr.msra.gmra.mrb[4].mxu1 %vm206_vm1, %v946_v48 }
 0x11c   :  { %712 = vmatpush3.bf16.msra.mxu1 %v760_v45 }
 0x11d   :  { %713 = vmatprep.subr.bf16.mxu1 %v761_v49 }
 0x120   :  { %714 = vmatpush3.bf16.msra.mxu1 %v761_v49 }
 0x121   :  { %715 = vmatprep.subr.bf16.mxu1 %v762_v50 }
 0x124   :  { %716 = vmatpush3.bf16.msra.mxu1 %v762_v50 }
 0x125   :  { %717 = vmatprep.subr.bf16.mxu1 %v763_v51 }
 0x128   :  { %718 = vmatpush3.bf16.msra.mxu1 %v763_v51 }
 0x129   :  { %719 = vmatprep.subr.bf16.mxu1 %v764_v52 }
 0x12c   :  { %720 = vmatpush3.bf16.msra.mxu1 %v764_v52 }
 0x12d   :  { %721 = vmatprep.subr.bf16.mxu1 %v765_v53 }
 0x130   :  { %722 = vmatpush3.bf16.msra.mxu1 %v765_v53 }
 0x131   :  { %723 = vmatprep.subr.bf16.mxu1 %v766_v54 }
 0x134   :  { %724 = vmatpush3.bf16.msra.mxu1 %v766_v54 }
 0x135   :  { %725 = vmatprep.subr.bf16.mxu1 %v767_v55 }
 0x138   :  { %726 = vmatpush3.bf16.msra.mxu1 %v767_v55 }
 0x1e6   :  { %v244_v57 = vpop.f32.mrb[0].mxu1 }
 0x1e7   :  { %v300_v58 = vmul.f32 %v244_v57, %v917_v25  ;;  %v703_v59 = vpop.f32.mrb[1].mxu1 }
 0x1e8   :  { %v247_v60 = vpop.f32.mrb[2].mxu1 }
 0x1e9   :  { %v310_v61 = vadd.f32 %v619_v56, %v300_v58  ;;  %v301_v62 = vmul.f32 %v247_v60, %v927_v32  ;;  %v704_v63 = vpop.f32.mrb[3].mxu1 }
 0x1eb   :  { %v334_v1 = vmul.f32 %v317_v0, %v310_v61  ;;  %v311_v2 = vadd.f32 %v619_v56, %v301_v62 }
 0x1ed   :  { %v335_v4 = vmul.f32 %v322_v3, %v311_v2  ;;  %v338_v6 = vmax.f32 %v334_v1, 0.0 }
 0x1ee   :  { %v293_v5 = vpop.f32.mrb[4].mxu1 }
 0x1ef   :  { %v339_v7 = vmax.f32 %v335_v4, 0.0  ;;  %v302_v8 = vmul.f32 %v293_v5, %v915_v24  ;;  %v709_v9 = vpop.f32.mrb[5].mxu1 }
 0x1f0   :  { %v296_v10 = vpop.f32.mrb[6].mxu1 }
 0x1f1   :  { %v312_v11 = vadd.f32 %v619_v56, %v302_v8  ;;  %v303_v12 = vmul.f32 %v296_v10, %v925_v30  ;;  %v710_v13 = vpop.f32.mrb[7].mxu1  ;;  %v342_v14 = vpack.c.bf16 %v339_v7, %v338_v6 }
 0x1f3   :  { %v336_v16 = vmul.f32 %v327_v15, %v312_v11  ;;  %v313_v17 = vadd.f32 %v619_v56, %v303_v12  ;;  %727 = vmatprep.mubr.bf16.mxu1 %v342_v14 }
 0x1f5   :  { %v337_v19 = vmul.f32 %v332_v18, %v313_v17  ;;  %v340_v20 = vmax.f32 %v336_v16, 0.0 }
 0x1f7   :  { %v341_v21 = vmax.f32 %v337_v19, 0.0 }
 0x1f9   :  { %v343_v22 = vpack.c.bf16 %v341_v21, %v340_v20 }
 0x1fb   :  { %728 = vmatmul.mubr.bf16.vlgmr.msra.gmra.mrb[8].mxu1 %v343_v22 }
 0x2ce   :  { %v729_v26 = vpop.f32.mrb[8].mxu1 }
 0x2cf   :  { %v445_v27 = vpop.f32.mrb[9].mxu1  ;;  %v462_v29 = vmul.f32 %v729_v26, %v915_v24 }
 0x2d0   :  { %v730_v28 = vpop.f32.mrb[10].mxu1  ;;  %v460_v34 = vmul.f32 %v445_v27, %v917_v25 }
 0x2d1   :  { %v463_v31 = vmul.f32 %v730_v28, %v925_v30  ;;  %v448_v33 = vpop.f32.mrb[11].mxu1 }
 0x2d2   :  { %v461_v35 = vmul.f32 %v448_v33, %v927_v32 }
 0x2d3   :  { %v465_v36 = vpack.c.bf16 %v463_v31, %v462_v29 }
 0x2d4   :  { %v464_v37 = vpack.c.bf16 %v461_v35, %v460_v34 }
 0x2d6   :  { %732 = vmatpush3.bf16.msra.mxu0 %v464_v37 }
 0x2d7   :  { %737 = vmatprep.subr.bf16.mxu0 %v820_v23 }
 0x2d9   :  { %734 = vmatmul.mubr.msk.bf16.vlgmr.msra.gmra.mrb[4].mxu0 %vm206_vm1, %v933_v42 }
 0x2da   :  { %738 = vmatpush3.bf16.msra.mxu0 %v465_v36  ;;  %739 = vmatprep.mubr.msk.bf16.mxu0 %vm821_vm0, %v820_v23 }
 0x2e1   :  { %740 = vmatmul.mubr.msk.bf16.vlgmr.msra.gmra.mrb[8].mxu0 %vm206_vm1, %v946_v48 }
 0x3ac   :  { %v500_v39 = vpop.f32.mrb[4].mxu0 }
 0x3ad   :  { %v548_v40 = vmul.f32 %v500_v39, %v917_v25  ;;  %v735_v41 = vpop.f32.mrb[5].mxu0 }
 0x3ae   :  { %v503_v43 = vpop.f32.mrb[6].mxu0 }
 0x3af   :  { %v558_v44 = vadd.f32 %v631_v38, %v548_v40  ;;  %v549_v45 = vmul.f32 %v503_v43, %v927_v32  ;;  %v736_v42 = vpop.f32.mrb[7].mxu0 }
 0x3b1   :  { %v562_v46 = vmul.f32 %v558_v44, %v317_v0  ;;  %v559_v47 = vadd.f32 %v631_v38, %v549_v45 }
 0x3b3   :  { %v563_v49 = vmul.f32 %v559_v47, %v322_v3  ;;  %v566_v50 = vmax.f32 %v562_v46, 0.0 }
 0x3b4   :  { %v541_v23 = vpop.f32.mrb[8].mxu0 }
 0x3b5   :  { %v567_v51 = vmax.f32 %v563_v49, 0.0  ;;  %v550_v48 = vmul.f32 %v541_v23, %v915_v24  ;;  %v741_v52 = vpop.f32.mrb[9].mxu0 }
 0x3b6   :  { %v544_v53 = vpop.f32.mrb[10].mxu0 }
 0x3b7   :  { %v560_v54 = vadd.f32 %v631_v38, %v550_v48  ;;  %v551_v55 = vmul.f32 %v544_v53, %v925_v30  ;;  %v742_v25 = vpop.f32.mrb[11].mxu0  ;;  %v643_v56 = vpack.c.bf16 %v567_v51, %v566_v50 }
 0x3b9   :  { %v564_v57 = vmul.f32 %v560_v54, %v327_v15  ;;  %v561_v58 = vadd.f32 %v631_v38, %v551_v55  ;;  %644 = vst [vmem:[#allocation5] sm:$0xff] %v643_v56  }
 0x3bb   :  { %v565_v32 = vmul.f32 %v561_v58, %v332_v18  ;;  %v568_v59 = vmax.f32 %v564_v57, 0.0 }
 0x3bd   :  { %v569_v60 = vmax.f32 %v565_v32, 0.0 }
 0x3bf   :  { %v648_v61 = vpack.c.bf16 %v569_v60, %v568_v59 }
 0x3c1   :  { %650 = vst [vmem:[#allocation5 + $0x8] sm:$0xff] %v648_v61  }
 0x3c2   :  { %801 = shalt.err (!%p798_p12)
}
 0x3c3   :  { %s802_s23 = scalar_lea.hbm %s996_s6, 256 }
 0x3c4   :  { %p803_p13 = scmp.ne.s32.totalorder %s996_s6, %s802_s23  ;;  %p806_p0 = scmp.lt.u32.totalorder %s802_s23, %s996_s6 }
 0x3c6   :  { %p808_p1 = pnand %p806_p0, %p803_p13 }
 0x3c8   :  { %811 = shalt.err (!%p808_p1)
}
 0x3c9   :  { %601 = dma.vmem_to_hbm [thread:$0]  %s596_s19, 256, %s996_s6, [#allocation4], %s817_s7, %s817_s7, %s818_s8  }
 0x3ca   :  { %814 = dma.done.wait [#allocation4], 256  }
 0x3cb   :  { %815 = vsyncadd [#allocation4], 4294967040 }
 0x3cc   :  { %605 = vsyncpa [#allocation3], 1 }
 0x3cd   :  { %606 = vsyncpa [#allocation4], 1 }

</bundles_post_ra>
